<compile_context>
chip_gen: v5e
topology: v5e:2x2
jax: 0.10.0
libtpu: 0.0.40
codegen_flags: <defaults>
</compile_context>

<pallas_src>
import numpy as np
import jax
import jax.numpy as jnp
from jax.experimental import pallas as pl
from jax.experimental.pallas import tpu as pltpu


# ----------------------------------------------------------------------------
# Host-side glue: build the spline "translate" basis exactly as the PyTorch
# __init__ does (numpy, deterministic given boundaries/strikes).
# ----------------------------------------------------------------------------
def get_translation_matrix(knots, dof):
    system = np.zeros((len(knots) * 3, 4 * (len(knots) + 1)))
    for i, x in zip(range(len(knots)), knots):
        system[3 * i, 4 * i] = x ** 3
        system[3 * i, 4 * i + 1] = x ** 2
        system[3 * i, 4 * i + 2] = x
        system[3 * i, 4 * i + 3] = 1
        system[3 * i, 4 * (i + 1)] = -x ** 3
        system[3 * i, 4 * (i + 1) + 1] = -x ** 2
        system[3 * i, 4 * (i + 1) + 2] = -x
        system[3 * i, 4 * (i + 1) + 3] = -1
    for i, x in zip(range(len(knots)), knots):
        system[3 * i + 1, 4 * i] = 3 * x ** 2
        system[3 * i + 1, 4 * i + 1] = 2 * x
        system[3 * i + 1, 4 * i + 2] = 1
        system[3 * i + 1, 4 * (i + 1)] = -3 * x ** 2
        system[3 * i + 1, 4 * (i + 1) + 1] = -2 * x
        system[3 * i + 1, 4 * (i + 1) + 2] = -1
    for i, x in zip(range(len(knots)), knots):
        system[3 * i + 2, 4 * i] = 6 * x
        system[3 * i + 2, 4 * i + 1] = 2
        system[3 * i + 2, 4 * (i + 1)] = -6 * x
        system[3 * i + 2, 4 * (i + 1) + 1] = -2
    _, _, V = np.linalg.svd(system)
    vecs = V[-dof:, :].T
    return vecs, system


def mid_constrained_basis(strike_knots, dof, X):
    """Same basis as the reference `mid_constrained` (xstar is unused by forward)."""
    constraints = []
    for i, x in strike_knots:
        new_arr = np.zeros(X.shape[1])
        new_arr[4 * i] = x ** 3
        new_arr[4 * i + 1] = x ** 2
        new_arr[4 * i + 2] = x
        new_arr[4 * i + 3] = 1
        constraints += [new_arr]
    Xdash = np.vstack([X] + constraints)
    _, _, V = np.linalg.svd(Xdash)
    basis = V[-(dof - len(strike_knots)):, :].T   # (4*(m+1), dof - n_knots)
    return basis


def build_smilenet_params(boundaries, strikes, key):
    """Master (f32, PyTorch-layout) parameters for the module."""
    dof = len(boundaries) + 4
    strike_knots = []
    count = 0
    for i in range(len(boundaries)):
        if boundaries[i] == strikes[count]:
            strike_knots += [(i, boundaries[count])]
            count += 1
    _, X = get_translation_matrix(boundaries, dof)
    basis = mid_constrained_basis(strike_knots, dof, X)     # (4*(m+1), d_out)

    strike_num = strikes.shape[0]
    d_in, d_h, d_out = strike_num * 2, strike_num * 4, dof - len(strike_knots)

    k1, k2, k3, k4, k5, k6 = jax.random.split(key, 6)
    scale = 0.1
    params = dict(
        w1=jax.random.normal(k1, (d_h, d_in), jnp.float32) * scale,
        b1=jax.random.normal(k2, (d_h,), jnp.float32) * scale,
        w2=jax.random.normal(k3, (d_h, d_h), jnp.float32) * scale,
        b2=jax.random.normal(k4, (d_h,), jnp.float32) * scale,
        w3=jax.random.normal(k5, (d_out, d_h), jnp.float32) * scale,
        b3=jax.random.normal(k6, (d_out,), jnp.float32) * scale,
        basis=jnp.asarray(basis, jnp.float32),
    )
    return params, (d_in, d_h, d_out)


def prepare_kernel_params(params, c_pad=128):
    """One-time host prep: fold basis into layer 3, pre-transpose, pad the
    output dim to a full 128-lane row, pack biases, cast matmul weights to bf16."""
    basis = params["basis"]                         # (coeffs, d_out)
    coeffs_dim = basis.shape[0]
    d_h = params["w1"].shape[0]
    d_in = params["w1"].shape[1]

    wf = basis @ params["w3"]                       # (coeffs, d_h)  -- exact fold
    bf = basis @ params["b3"]                       # (coeffs,)

    wft = jnp.zeros((d_h, c_pad), jnp.float32).at[:, :coeffs_dim].set(wf.T)
    bf_pad = jnp.zeros((1, c_pad), jnp.float32).at[0, :coeffs_dim].set(bf)

    kp = dict(
        w1t=jnp.asarray(params["w1"].T, jnp.bfloat16),      # (d_in, d_h)
        w2t=jnp.asarray(params["w2"].T, jnp.bfloat16),      # (d_h, d_h)
        wft=wft.astype(jnp.bfloat16),                       # (d_h, c_pad)
        b12=jnp.stack([params["b1"], params["b2"]]),        # (2, d_h) f32
        bf=bf_pad,                                          # (1, c_pad) f32
    )
    meta = dict(d_in=d_in, d_h=d_h, coeffs_dim=coeffs_dim, c_pad=c_pad)
    return kp, meta


# ----------------------------------------------------------------------------
# Pallas kernel: two bf16 MXU matmuls + LeakyReLU + fused (basis-folded) output
# projection.  One grid step processes TB batch rows; weights stay resident.
# ----------------------------------------------------------------------------
def smilenet_kernel(x_ref, w1t_ref, w2t_ref, wft_ref, b12_ref, bf_ref, out_ref):
    slope = jnp.float32(0.01)  # PyTorch LeakyReLU default negative_slope

    x = x_ref[...]                                                   # (TB, d_in) f32
    h1 = jnp.dot(x.astype(jnp.bfloat16), w1t_ref[...],
                 preferred_element_type=jnp.float32) + b12_ref[0:1, :]
    h1 = jnp.where(h1 >= 0, h1, slope * h1)

    h2 = jnp.dot(h1.astype(jnp.bfloat16), w2t_ref[...],
                 preferred_element_type=jnp.float32) + b12_ref[1:2, :]
    h2 = jnp.where(h2 >= 0, h2, slope * h2)

    # sol.T = h2 @ (basis @ w3).T + basis @ b3   (lane-dense, 128-padded output)
    out_ref[...] = jnp.dot(h2.astype(jnp.bfloat16), wft_ref[...],
                           preferred_element_type=jnp.float32) + bf_ref[...]


def smilenet_forward(x, kp, meta, *, tb=128):
    B = x.shape[0]
    d_in, d_h = meta["d_in"], meta["d_h"]
    c_pad, coeffs_dim = meta["c_pad"], meta["coeffs_dim"]

    b_pad = pl.cdiv(B, tb) * tb
    if b_pad != B:
        x = jnp.pad(x, ((0, b_pad - B), (0, 0)))
    grid = (b_pad // tb,)

    flops = 2 * b_pad * (d_in * d_h + d_h * d_h + d_h * c_pad)
    bytes_accessed = (x.size * 4 + kp["w1t"].size * 2 + kp["w2t"].size * 2
                      + kp["wft"].size * 2 + kp["b12"].size * 4
                      + kp["bf"].size * 4 + b_pad * c_pad * 4)

    out = pl.pallas_call(
        smilenet_kernel,
        out_shape=jax.ShapeDtypeStruct((b_pad, c_pad), jnp.float32),
        grid_spec=pltpu.PrefetchScalarGridSpec(
            num_scalar_prefetch=0,
            grid=grid,
            in_specs=[
                pl.BlockSpec((tb, d_in), lambda i: (i, 0)),      # x tile
                pl.BlockSpec((d_in, d_h), lambda i: (0, 0)),     # w1.T (resident)
                pl.BlockSpec((d_h, d_h), lambda i: (0, 0)),      # w2.T (resident)
                pl.BlockSpec((d_h, c_pad), lambda i: (0, 0)),    # folded Wf.T
                pl.BlockSpec((2, d_h), lambda i: (0, 0)),        # packed b1,b2
                pl.BlockSpec((1, c_pad), lambda i: (0, 0)),      # folded bias
            ],
            out_specs=pl.BlockSpec((tb, c_pad), lambda i: (i, 0)),
        ),
        compiler_params=pltpu.CompilerParams(
            dimension_semantics=("parallel",)),
        cost_estimate=pl.CostEstimate(flops=flops, transcendentals=0,
                                      bytes_accessed=bytes_accessed),
    )(x, kp["w1t"], kp["w2t"], kp["wft"], kp["b12"], kp["bf"])

    # Back to the reference layout: sol = (4*(m+1), B).
    return out[:B, :coeffs_dim].T


def smilenet_reference(x, params):
    """Pure f32, unfolded reference (matches the PyTorch forward)."""
    slope = 0.01
    h1 = x @ params["w1"].T + params["b1"]
    h1 = jnp.where(h1 >= 0, h1, slope * h1)
    h2 = h1 @ params["w2"].T + params["b2"]
    h2 = jnp.where(h2 >= 0, h2, slope * h2)
    control = h2 @ params["w3"].T + params["b3"]
    return params["basis"] @ control.T


if __name__ == "__main__":
    # Deterministic setup: 8 spline boundaries, all of them strike knots.
    m = 8
    boundaries = np.linspace(-1.0, 1.0, m)
    strikes = boundaries.copy()

    key = jax.random.PRNGKey(0)
    k_params, k_x = jax.random.split(key)
    params, (d_in, d_h, d_out) = build_smilenet_params(boundaries, strikes, k_params)
    kparams, meta = prepare_kernel_params(params)

    # Batched workload: amortize weight DMA / per-call overhead over batch rows.
    B = 256
    x = jax.random.normal(k_x, (B, d_in), jnp.float32)

    sol = smilenet_forward(x, kparams, meta, tb=128)
    sol = jax.block_until_ready(sol)

    ref = smilenet_reference(x, params)
    assert sol.shape == (4 * (m + 1), B), sol.shape
    # Tolerance accounts for bf16 weight/activation storage feeding the MXU
    # (f32 accumulation); f32 master weights are the ground truth.
    np.testing.assert_allclose(np.asarray(sol), np.asarray(ref),
                               rtol=5e-2, atol=5e-3)

    print("KERNEL_OK")
</pallas_src>

<mosaic_0001>
module attributes {stable_mosaic.version = 11 : i64} {
  func.func @smilenet_kernel(%arg0: i32, %arg1: memref<128x16xf32, #tpu.memory_space<vmem>>, %arg2: memref<16x32xbf16, #tpu.memory_space<vmem>>, %arg3: memref<32x32xbf16, #tpu.memory_space<vmem>>, %arg4: memref<32x128xbf16, #tpu.memory_space<vmem>>, %arg5: memref<2x32xf32, #tpu.memory_space<vmem>>, %arg6: memref<1x128xf32, #tpu.memory_space<vmem>>, %arg7: memref<128x128xf32, #tpu.memory_space<vmem>>) attributes {dimension_semantics = [#tpu.dimension_semantics<parallel>], iteration_bounds = array<i64: 2>, scalar_prefetch = 0 : i64, scratch_operands = 0 : i64, tpu.core_type = #tpu.core_type<tc>, window_params = [{transform_indices = @transform_0, window_bounds = array<i64: 128, 16>}, {pipeline_mode = #tpu.pipeline_mode<synchronous>, transform_indices = @transform_1, window_bounds = array<i64: 16, 32>}, {pipeline_mode = #tpu.pipeline_mode<synchronous>, transform_indices = @transform_2, window_bounds = array<i64: 32, 32>}, {pipeline_mode = #tpu.pipeline_mode<synchronous>, transform_indices = @transform_3, window_bounds = array<i64: 32, 128>}, {pipeline_mode = #tpu.pipeline_mode<synchronous>, transform_indices = @transform_4, window_bounds = array<i64: 2, 32>}, {pipeline_mode = #tpu.pipeline_mode<synchronous>, transform_indices = @transform_5, window_bounds = array<i64: 1, 128>}, {transform_indices = @transform_6, window_bounds = array<i64: 128, 128>}]} {
    %c0 = arith.constant 0 : index
    %c0_0 = arith.constant 0 : index
    %0 = vector.load %arg1[%c0, %c0_0] : memref<128x16xf32, #tpu.memory_space<vmem>>, vector<128x16xf32>
    %1 = arith.truncf %0 : vector<128x16xf32> to vector<128x16xbf16>
    %c0_1 = arith.constant 0 : index
    %c0_2 = arith.constant 0 : index
    %2 = vector.load %arg2[%c0_1, %c0_2] : memref<16x32xbf16, #tpu.memory_space<vmem>>, vector<16x32xbf16>
    %cst = arith.constant dense<0.000000e+00> : vector<128x32xf32>
    %3 = tpu.matmul %1, %2, %cst {dimension_numbers = #tpu.dot_dimension_numbers<[1], [0], [0], [1], [0, 0, 1, 1], [], []>} : vector<128x16xbf16>, vector<16x32xbf16>, vector<128x32xf32> -> vector<128x32xf32>
    %c0_3 = arith.constant 0 : index
    %c0_4 = arith.constant 0 : index
    %4 = vector.load %arg5[%c0_3, %c0_4] : memref<2x32xf32, #tpu.memory_space<vmem>>, vector<1x32xf32>
    %5 = vector.broadcast %4 : vector<1x32xf32> to vector<128x32xf32>
    %6 = arith.addf %3, %5 : vector<128x32xf32>
    %cst_5 = arith.constant 0.000000e+00 : f32
    %7 = vector.broadcast %cst_5 : f32 to vector<128x32xf32>
    %8 = arith.cmpf oge, %6, %7 : vector<128x32xf32>
    %cst_6 = arith.constant 0.00999999977 : f32
    %9 = vector.broadcast %cst_6 : f32 to vector<128x32xf32>
    %10 = arith.mulf %9, %6 : vector<128x32xf32>
    %11 = arith.select %8, %6, %10 : vector<128x32xi1>, vector<128x32xf32>
    %12 = arith.truncf %11 : vector<128x32xf32> to vector<128x32xbf16>
    %c0_7 = arith.constant 0 : index
    %c0_8 = arith.constant 0 : index
    %13 = vector.load %arg3[%c0_7, %c0_8] : memref<32x32xbf16, #tpu.memory_space<vmem>>, vector<32x32xbf16>
    %cst_9 = arith.constant dense<0.000000e+00> : vector<128x32xf32>
    %14 = tpu.matmul %12, %13, %cst_9 {dimension_numbers = #tpu.dot_dimension_numbers<[1], [0], [0], [1], [0, 0, 1, 1], [], []>} : vector<128x32xbf16>, vector<32x32xbf16>, vector<128x32xf32> -> vector<128x32xf32>
    %c1 = arith.constant 1 : index
    %c0_10 = arith.constant 0 : index
    %15 = vector.load %arg5[%c1, %c0_10] : memref<2x32xf32, #tpu.memory_space<vmem>>, vector<1x32xf32>
    %16 = vector.broadcast %15 : vector<1x32xf32> to vector<128x32xf32>
    %17 = arith.addf %14, %16 : vector<128x32xf32>
    %cst_11 = arith.constant 0.000000e+00 : f32
    %18 = vector.broadcast %cst_11 : f32 to vector<128x32xf32>
    %19 = arith.cmpf oge, %17, %18 : vector<128x32xf32>
    %cst_12 = arith.constant 0.00999999977 : f32
    %20 = vector.broadcast %cst_12 : f32 to vector<128x32xf32>
    %21 = arith.mulf %20, %17 : vector<128x32xf32>
    %22 = arith.select %19, %17, %21 : vector<128x32xi1>, vector<128x32xf32>
    %23 = arith.truncf %22 : vector<128x32xf32> to vector<128x32xbf16>
    %c0_13 = arith.constant 0 : index
    %c0_14 = arith.constant 0 : index
    %24 = vector.load %arg4[%c0_13, %c0_14] : memref<32x128xbf16, #tpu.memory_space<vmem>>, vector<32x128xbf16>
    %cst_15 = arith.constant dense<0.000000e+00> : vector<128x128xf32>
    %25 = tpu.matmul %23, %24, %cst_15 {dimension_numbers = #tpu.dot_dimension_numbers<[1], [0], [0], [1], [0, 0, 1, 1], [], []>} : vector<128x32xbf16>, vector<32x128xbf16>, vector<128x128xf32> -> vector<128x128xf32>
    %c0_16 = arith.constant 0 : index
    %c0_17 = arith.constant 0 : index
    %26 = vector.load %arg6[%c0_16, %c0_17] : memref<1x128xf32, #tpu.memory_space<vmem>>, vector<1x128xf32>
    %27 = vector.broadcast %26 : vector<1x128xf32> to vector<128x128xf32>
    %28 = arith.addf %25, %27 : vector<128x128xf32>
    %c0_18 = arith.constant 0 : index
    %c0_19 = arith.constant 0 : index
    %29 = vector.load %arg7[%c0_18, %c0_19] : memref<128x128xf32, #tpu.memory_space<vmem>>, vector<128x128xf32>
    tpu.vector_store %arg7[%c0_18, %c0_19], %28 {strides = array<i32>} : memref<128x128xf32, #tpu.memory_space<vmem>>, vector<128x128xf32>,
    return
  }
  func.func @transform_0(%arg0: i32) -> (i32, i32) {
    %c0_i32 = arith.constant 0 : i32
    %c0_i32_0 = arith.constant 0 : i32
    return %arg0, %c0_i32 : i32, i32
  }
  func.func @transform_1(%arg0: i32) -> (i32, i32) {
    %c0_i32 = arith.constant 0 : i32
    %c0_i32_0 = arith.constant 0 : i32
    %c0_i32_1 = arith.constant 0 : i32
    return %c0_i32, %c0_i32_0 : i32, i32
  }
  func.func @transform_2(%arg0: i32) -> (i32, i32) {
    %c0_i32 = arith.constant 0 : i32
    %c0_i32_0 = arith.constant 0 : i32
    %c0_i32_1 = arith.constant 0 : i32
    return %c0_i32, %c0_i32_0 : i32, i32
  }
  func.func @transform_3(%arg0: i32) -> (i32, i32) {
    %c0_i32 = arith.constant 0 : i32
    %c0_i32_0 = arith.constant 0 : i32
    %c0_i32_1 = arith.constant 0 : i32
    return %c0_i32, %c0_i32_0 : i32, i32
  }
  func.func @transform_4(%arg0: i32) -> (i32, i32) {
    %c0_i32 = arith.constant 0 : i32
    %c0_i32_0 = arith.constant 0 : i32
    %c0_i32_1 = arith.constant 0 : i32
    return %c0_i32, %c0_i32_0 : i32, i32
  }
  func.func @transform_5(%arg0: i32) -> (i32, i32) {
    %c0_i32 = arith.constant 0 : i32
    %c0_i32_0 = arith.constant 0 : i32
    %c0_i32_1 = arith.constant 0 : i32
    return %c0_i32, %c0_i32_0 : i32, i32
  }
  func.func @transform_6(%arg0: i32) -> (i32, i32) {
    %c0_i32 = arith.constant 0 : i32
    %c0_i32_0 = arith.constant 0 : i32
    return %arg0, %c0_i32 : i32, i32
  }
}

</mosaic_0001>

<bundles_post_ra>
// kernel: tpu_custom_call.1
= control target key start
LH: loop header
LB: loop body
LE: loop exit
PB: predicated region body
PF: predicated region fallthrough
CT: control target
= control target key end

     0   :  { %11 = vsyncpa [#allocation3], 0  ;;  %s1174_s0 = inlined_call_operand.vmem [shape: f32[256,16], index: 0, kind: input, shape index: {}]   ;;  %s1175_s1 = inlined_call_operand.vmem [shape: bf16[16,32], index: 1, kind: input, shape index: {}]   ;;  %s1176_s2 = inlined_call_operand.vmem [shape: bf16[32,32], index: 2, kind: input, shape index: {}]   ;;  %s1177_s3 = inlined_call_operand.vmem [shape: bf16[32,128], index: 3, kind: input, shape index: {}]   ;;  %s1178_s4 = inlined_call_operand.vmem [shape: f32[2,32], index: 4, kind: input, shape index: {}]   ;;  %s1179_s5 = inlined_call_operand.vmem [shape: f32[1,128], index: 5, kind: input, shape index: {}]   ;;  %s1180_s6 = inlined_call_operand.hbm [shape: f32[256,128], index: 6, kind: output, shape index: {}]  }
   0x1   :  { %13 = vsyncpa [#allocation3 + $0x1], 0  ;;  %s965_s21 = smov 0   ;;  %s967_s22 = smov 0  }
   0x2   :  { %s969_s23 = smov 0   ;;  %s971_s24 = smov 0  }
   0x3 LB: > { %s986_s25 = sadd.s32 4294967295, %s926_s24   ;;  %s753_s26 = sadd.s32 4294967294, %s926_s24   ;;  %s926_s24 = sphi %s971_s24, %s1186_s24   ;;  %s922_s23 = sphi %s969_s23, %s1185_s23   ;;  %s918_s22 = sphi %s967_s22, %s1184_s22   ;;  %s914_s21 = sphi %s965_s21, %s1183_s21  }
   0x4   : > { %s990_s27 = sadd.s32 1, %s926_s24   ;;  %s157_s28 = sadd.s32 1, %s922_s23 }
   0x5   : > { %s154_s29 = ssub.s32 %s926_s24, %s990_s27  ;;  %p167_p0 = scmp.ne.s32.totalorder %s922_s23, %s918_s22 }
   0x6   : > { %p155_p1 = scmp.eq.s32.totalorder %s154_s29, 0  ;;  %p168_p2 = scmp.eq.s32.totalorder %s986_s25, 1 }
   0x7   : > { %p173_p3 = scmp.ne.s32.totalorder %s918_s22, %s914_s21  ;;  %p174_p4 = scmp.eq.s32.totalorder %s753_s26, 1 }
   0x8   : > { %s1001_s30 = scalar_select %p155_p1, %s922_s23, %s157_s28  }
   0x9   : > { %p1003_p5 = por %p168_p2, %p167_p0  ;;  %p1007_p6 = por %p174_p4, %p173_p3 }
   0xa   : > { %p756_p7 = scmp.ge.s32.totalorder %s926_s24, 1  ;;  %p216_p8 = scmp.lt.s32.totalorder %s926_s24, 3 }
   0xc   : > { %p217_p9 = pnand %p756_p7, %p216_p8 }
   0xd   : > { %s758_s11 = sshll.u32 (!%p217_p9), %s986_s25, 4  ;;  %s243_s13 = sand.u32 (!%p217_p9), 1, %s918_s22  }
   0xe   : > { %220 = sbr.rel (%p217_p9) target bundleno = 571 (0x23b), region = 44  ;;  %p247_p10 = scmp.lt.s32.totalorder (!%p217_p9), %s758_s11, 31 }
   0xf   : > { %s757_s14 = sshll.u32 (!%p217_p9), %s243_s13, 7  ;;  %s814_s18 = sshll.u32 (!%p217_p9), %s986_s25, 7 }
  0x10   : > { %s1122_s17 = scalar_lea.vmem (!%p217_p9), [#allocation2], %s757_s14  ;;  %s687_s26 = scalar_lea.hbm (!%p217_p9), %s1180_s6, %s814_s18 }
  0x11   : > { %s688_s28 = sshll.u32 (!%p217_p9), %s1122_s17, 4  ;;  %s690_s29 = sshll.u32 (!%p217_p9), %s687_s26, 4  ;;  %s689_s28 = int_to_ptr.vmem [resolvable:$true] %s688_s28  ;;  %s691_s29 = int_to_ptr.hbm [resolvable:$true] %s690_s29 }
  0x12   : > { %s676_s9 = scalar_lea.sflag (!%p217_p9), [#allocation3], %s243_s13  ;;  %s878_s10 = sshra.s32 (!%p217_p9), %s691_s29, 4  ;;  %s879_s10 = int_to_ptr.hbm [resolvable:$true] %s878_s10 }
  0x13   : > { %v809_v0 = vld [vmem:[%s1175_s1] sm:$0xff]  ;;  %s1188_s11 = smov (!%p247_p10, %s758_s11), 31  ;;  %vm288_vm0 = vcmask 130048   ;;  %v811_v25 = vld [vmem:[%s1176_s2 + $0x8] sm:$0xff]  ;;  %vm436_vm3 = vcmask 261120   ;;  %s880_s25 = scalar_lea.hbm %s879_s10, 128 }
  0x14   : > { %320 = vmatpush.bf16.msra.mxu0 %v809_v0  ;;  %815 = vmatpush.bf16.msra.mxu3 %v809_v0  ;;  %s759_s12 = sshll.u32 %s1188_s11, 3  ;;  %v810_v26 = vld [vmem:[%s1176_s2] sm:$0xff]  ;;  %p881_p11 = scmp.ne.s32.totalorder %s879_s10, %s880_s25 }
  0x15   : > { %s1020_s15 = scalar_lea.vmem %s1174_s0, %s759_s12  ;;  %467 = vmatpush.bf16.msra.mxu1 %v811_v25  ;;  %v1055_v28 = vld [vmem:[%s1178_s4] ss:$0 sm:$0xff]  ;;  %s884_s14 = scalar_lea.hbm %s1180_s6, 256 }
  0x16   : > { %v254_v1 = vld [vmem:[%s1020_s15] sm:$0xff]  ;;  %v255_v2 = vld [vmem:[%s1020_s15 + $0x8] sm:$0xff]  ;;  %v256_v4 = vld [vmem:[%s1020_s15 + $0x10] sm:$0xff]  ;;  %p882_p12 = pnand %p881_p11, %p1003_p5  ;;  %p885_p0 = scmp.lt.s32.totalorder %s879_s10, %s1180_s6 }
  0x17   : > { %v270_v3 = vpack.c.bf16 %v255_v2, %v254_v1  ;;  %v257_v5 = vld [vmem:[%s1020_s15 + $0x18] sm:$0xff]  ;;  %v258_v7 = vld [vmem:[%s1020_s15 + $0x20] sm:$0xff]  ;;  %v259_v8 = vld [vmem:[%s1020_s15 + $0x28] sm:$0xff]  ;;  %p886_p1 = scmp.lt.s32.totalorder %s884_s14, %s880_s25 }
  0x18   : > { %v271_v6 = vpack.c.bf16 %v257_v5, %v256_v4  ;;  %v272_v9 = vpack.c.bf16 %v259_v8, %v258_v7  ;;  %v260_v10 = vld [vmem:[%s1020_s15 + $0x30] sm:$0xff]  ;;  %v261_v11 = vld [vmem:[%s1020_s15 + $0x38] sm:$0xff]  ;;  %v262_v13 = vld [vmem:[%s1020_s15 + $0x40] sm:$0xff]  ;;  %816 = vmatpush.bf16.msrb.mxu3 %v811_v25  ;;  %p883_p13 = pneg %p882_p12 }
  0x19   : > { %764 = vmatmul.msk.bf16.vlgmr.msra.gmra.mxu0 %vm288_vm0, %v270_v3  ;;  %v273_v12 = vpack.c.bf16 %v261_v11, %v260_v10  ;;  %v263_v14 = vld [vmem:[%s1020_s15 + $0x48] sm:$0xff]  ;;  %v268_v16 = vld [vmem:[%s1020_s15 + $0x70] sm:$0xff]  ;;  %v269_v17 = vld [vmem:[%s1020_s15 + $0x78] sm:$0xff]  ;;  %468 = vmatpush.bf16.msra.mxu1 %v810_v26  ;;  %p887_p2 = por %p886_p1, %p885_p0 }
  0x1a   : > { %v274_v15 = vpack.c.bf16 %v263_v14, %v262_v13  ;;  %v277_v18 = vpack.c.bf16 %v269_v17, %v268_v16  ;;  %v264_v19 = vld [vmem:[%s1020_s15 + $0x50] sm:$0xff]  ;;  %v265_v20 = vld [vmem:[%s1020_s15 + $0x58] sm:$0xff]  ;;  %v266_v22 = vld [vmem:[%s1020_s15 + $0x60] sm:$0xff] }
  0x1b   : > { %v275_v21 = vpack.c.bf16 %v265_v20, %v264_v19  ;;  %v267_v23 = vld [vmem:[%s1020_s15 + $0x68] sm:$0xff]  ;;  %p888_p3 = pnand %p887_p2, %p883_p13 }
  0x1c   : > { %771 = vmatmul.msk.bf16.vlgmr.msra.gmra.mxu3 %vm288_vm0, %v277_v18  ;;  %v276_v24 = vpack.c.bf16 %v267_v23, %v266_v22 }
  0x1d   : > { %817 = vmatpush.bf16.msrb.mxu3 %v810_v26 }
  0x29   : > { %765 = vmatmul.msk.bf16.gmra.mxu0 %vm288_vm0, %v271_v6 }
  0x39   : > { %766 = vmatmul.msk.bf16.gmra.mxu0 %vm288_vm0, %v272_v9 }
  0x49   : > { %767 = vmatmul.msk.bf16.gmra.mxu0 %vm288_vm0, %v273_v12 }
  0x59   : > { %768 = vmatmul.msk.bf16.gmra.mxu0 %vm288_vm0, %v274_v15 }
  0x69   : > { %769 = vmatmul.msk.bf16.gmra.mxu0 %vm288_vm0, %v275_v21 }
  0x79   : > { %770 = vmatmul.msk.bf16.gmra.mxu0 %vm288_vm0, %v276_v24 }
  0x96   : > { %v322_v27 = vpop.f32.mrf.mxu0 }
  0x97   : > { %v323_v29 = vadd.f32 %v1055_v28, %v322_v27 }
  0x99   : > { %v378_v31 = vmul.f32 0.01, %v323_v29  ;;  %vm362_vm1 = vcmp.ge.f32.partialorder %v323_v29, 0.0 }
  0x9b   : > { %v394_v34 = vsel %vm362_vm1, %v323_v29, %v378_v31 }
  0x9e   : > { %v324_v30 = vpop.f32.mrf.mxu0 }
  0x9f   : > { %v325_v32 = vadd.f32 %v1055_v28, %v324_v30  ;;  %v357_v20 = vpop.f32.mrf.mxu3 }
  0xa0   : > { %v358_v30 = vadd.f32 %v1055_v28, %v357_v20 }
  0xa1   : > { %vm363_vm2 = vcmp.ge.f32.partialorder %v325_v32, 0.0  ;;  %v379_v33 = vmul.f32 0.01, %v325_v32 }
  0xa2   : > { %vm376_vm0 = vcmp.ge.f32.partialorder %v358_v30, 0.0 }
  0xa3   : > { %v395_v35 = vsel %vm363_vm2, %v325_v32, %v379_v33  ;;  %v813_v32 = vld [vmem:[%s1177_s3 + $0x8] sm:$0xff]  ;;  %v392_v33 = vmul.f32 0.01, %v358_v30 }
  0xa4   : > { %v410_v36 = vpack.c.bf16 %v395_v35, %v394_v34  ;;  %616 = vmatpush.bf16.msra.mxu2 %v813_v32  ;;  %818 = vmatpush.bf16.msra.mxu3 %v813_v32  ;;  %v812_v35 = vld [vmem:[%s1177_s3] sm:$0xff] }
  0xa6   : > { %v327_v37 = vpop.f32.mrf.mxu0  ;;  %780 = vmatmul.msk.bf16.vlgmr.msra.gmra.mxu1 %vm436_vm3, %v410_v36  ;;  %v408_v36 = vsel %vm376_vm0, %v358_v30, %v392_v33 }
  0xa7   : > { %v328_v38 = vadd.f32 %v1055_v28, %v327_v37  ;;  %v359_v29 = vpop.f32.mrf.mxu3 }
  0xa8   : > { %v360_v31 = vadd.f32 %v1055_v28, %v359_v29  ;;  %617 = vmatpush.bf16.msra.mxu2 %v812_v35  ;;  %819 = vmatpush.bf16.msra.mxu3 %v812_v35 }
  0xa9   : > { %v380_v40 = vmul.f32 0.01, %v328_v38  ;;  %vm364_vm4 = vcmp.ge.f32.partialorder %v328_v38, 0.0 }
  0xaa   : > { %v393_v34 = vmul.f32 0.01, %v360_v31  ;;  %vm377_vm1 = vcmp.ge.f32.partialorder %v360_v31, 0.0 }
  0xab   : > { %v396_v43 = vsel %vm364_vm4, %v328_v38, %v380_v40 }
  0xac   : > { %v409_v37 = vsel %vm377_vm1, %v360_v31, %v393_v34 }
  0xad   : > { %v417_v38 = vpack.c.bf16 %v409_v37, %v408_v36 }
  0xae   : > { %v329_v39 = vpop.f32.mrf.mxu0 }
  0xaf   : > { %v330_v41 = vadd.f32 %v1055_v28, %v329_v39  ;;  %v1090_v39 = vld [vmem:[%s1178_s4 + $0x1] ss:$0 sm:$0xff] }
  0xb1   : > { %vm365_vm5 = vcmp.ge.f32.partialorder %v330_v41, 0.0  ;;  %v381_v42 = vmul.f32 0.01, %v330_v41 }
  0xb3   : > { %v397_v44 = vsel %vm365_vm5, %v330_v41, %v381_v42 }
  0xb4   : > { %v411_v45 = vpack.c.bf16 %v397_v44, %v396_v43 }
  0xb6   : > { %v332_v46 = vpop.f32.mrf.mxu0  ;;  %781 = vmatmul.msk.bf16.gmra.mxu1 %vm436_vm3, %v411_v45 }
  0xb7   : > { %v333_v47 = vadd.f32 %v1055_v28, %v332_v46 }
  0xb9   : > { %v382_v49 = vmul.f32 0.01, %v333_v47  ;;  %vm366_vm6 = vcmp.ge.f32.partialorder %v333_v47, 0.0 }
  0xbb   : > { %v398_v52 = vsel %vm366_vm6, %v333_v47, %v382_v49 }
  0xbe   : > { %v334_v48 = vpop.f32.mrf.mxu0 }
  0xbf   : > { %v335_v50 = vadd.f32 %v1055_v28, %v334_v48 }
  0xc1   : > { %vm367_vm7 = vcmp.ge.f32.partialorder %v335_v50, 0.0  ;;  %v383_v51 = vmul.f32 0.01, %v335_v50 }
  0xc3   : > { %v399_v53 = vsel %vm367_vm7, %v335_v50, %v383_v51 }
  0xc4   : > { %v412_v54 = vpack.c.bf16 %v399_v53, %v398_v52 }
  0xc6   : > { %v337_v55 = vpop.f32.mrf.mxu0  ;;  %782 = vmatmul.msk.bf16.gmra.mxu1 %vm436_vm3, %v412_v54 }
  0xc7   : > { %v338_v56 = vadd.f32 %v1055_v28, %v337_v55 }
  0xc9   : > { %v384_v58 = vmul.f32 0.01, %v338_v56  ;;  %vm368_vm8 = vcmp.ge.f32.partialorder %v338_v56, 0.0 }
  0xcb   : > { %v400_v61 = vsel %vm368_vm8, %v338_v56, %v384_v58 }
  0xce   : > { %v339_v57 = vpop.f32.mrf.mxu0 }
  0xcf   : > { %v340_v59 = vadd.f32 %v1055_v28, %v339_v57 }
  0xd1   : > { %vm369_vm9 = vcmp.ge.f32.partialorder %v340_v59, 0.0  ;;  %v385_v60 = vmul.f32 0.01, %v340_v59 }
  0xd3   : > { %v401_v62 = vsel %vm369_vm9, %v340_v59, %v385_v60 }
  0xd4   : > { %v413_v63 = vpack.c.bf16 %v401_v62, %v400_v61 }
  0xd6   : > { %v342_v0 = vpop.f32.mrf.mxu0  ;;  %783 = vmatmul.msk.bf16.gmra.mxu1 %vm436_vm3, %v413_v63 }
  0xd7   : > { %v343_v1 = vadd.f32 %v1055_v28, %v342_v0 }
  0xd9   : > { %v386_v3 = vmul.f32 0.01, %v343_v1  ;;  %vm370_vm10 = vcmp.ge.f32.partialorder %v343_v1, 0.0 }
  0xdb   : > { %v402_v6 = vsel %vm370_vm10, %v343_v1, %v386_v3 }
  0xde   : > { %v344_v2 = vpop.f32.mrf.mxu0 }
  0xdf   : > { %v345_v4 = vadd.f32 %v1055_v28, %v344_v2 }
  0xe1   : > { %vm371_vm11 = vcmp.ge.f32.partialorder %v345_v4, 0.0  ;;  %v387_v5 = vmul.f32 0.01, %v345_v4 }
  0xe3   : > { %v403_v7 = vsel %vm371_vm11, %v345_v4, %v387_v5 }
  0xe4   : > { %v414_v8 = vpack.c.bf16 %v403_v7, %v402_v6 }
  0xe6   : > { %v347_v9 = vpop.f32.mrf.mxu0  ;;  %784 = vmatmul.msk.bf16.gmra.mxu1 %vm436_vm3, %v414_v8 }
  0xe7   : > { %v348_v10 = vadd.f32 %v1055_v28, %v347_v9 }
  0xe9   : > { %v388_v12 = vmul.f32 0.01, %v348_v10  ;;  %vm372_vm12 = vcmp.ge.f32.partialorder %v348_v10, 0.0 }
  0xeb   : > { %v404_v15 = vsel %vm372_vm12, %v348_v10, %v388_v12 }
  0xee   : > { %v349_v11 = vpop.f32.mrf.mxu0 }
  0xef   : > { %v350_v13 = vadd.f32 %v1055_v28, %v349_v11 }
  0xf1   : > { %vm373_vm13 = vcmp.ge.f32.partialorder %v350_v13, 0.0  ;;  %v389_v14 = vmul.f32 0.01, %v350_v13 }
  0xf3   : > { %v405_v16 = vsel %vm373_vm13, %v350_v13, %v389_v14 }
  0xf4   : > { %v415_v17 = vpack.c.bf16 %v405_v16, %v404_v15 }
  0xf6   : > { %v352_v18 = vpop.f32.mrf.mxu0  ;;  %785 = vmatmul.msk.bf16.gmra.mxu1 %vm436_vm3, %v415_v17 }
  0xf7   : > { %v353_v19 = vadd.f32 %v1055_v28, %v352_v18 }
  0xf9   : > { %v390_v22 = vmul.f32 0.01, %v353_v19  ;;  %vm374_vm14 = vcmp.ge.f32.partialorder %v353_v19, 0.0 }
  0xfb   : > { %v406_v25 = vsel %vm374_vm14, %v353_v19, %v390_v22 }
  0xfe   : > { %v354_v21 = vpop.f32.mrf.mxu0 }
  0xff   : > { %v355_v23 = vadd.f32 %v1055_v28, %v354_v21 }
 0x101   : > { %vm375_vm15 = vcmp.ge.f32.partialorder %v355_v23, 0.0  ;;  %v391_v24 = vmul.f32 0.01, %v355_v23 }
 0x103   : > { %v407_v26 = vsel %vm375_vm15, %v355_v23, %v391_v24 }
 0x104   : > { %v416_v27 = vpack.c.bf16 %v407_v26, %v406_v25 }
 0x106   : > { %786 = vmatmul.msk.bf16.vlgmr.msrb.gmra.mxu3 %vm436_vm3, %v416_v27 }
 0x116   : > { %787 = vmatmul.msk.bf16.gmra.mxu3 %vm436_vm3, %v417_v38 }
 0x123   : > { %v470_v28 = vpop.f32.mrf.mxu1 }
 0x124   : > { %v471_v40 = vadd.f32 %v1090_v39, %v470_v28 }
 0x126   : > { %v526_v42 = vmul.f32 0.01, %v471_v40  ;;  %vm510_vm2 = vcmp.ge.f32.partialorder %v471_v40, 0.0 }
 0x128   : > { %v542_v45 = vsel %vm510_vm2, %v471_v40, %v526_v42 }
 0x12b   : > { %v472_v41 = vpop.f32.mrf.mxu1 }
 0x12c   : > { %v473_v43 = vadd.f32 %v1090_v39, %v472_v41 }
 0x12e   : > { %vm511_vm4 = vcmp.ge.f32.partialorder %v473_v43, 0.0  ;;  %v527_v44 = vmul.f32 0.01, %v473_v43 }
 0x130   : > { %v543_v46 = vsel %vm511_vm4, %v473_v43, %v527_v44 }
 0x131   : > { %v558_v47 = vpack.c.bf16 %v543_v46, %v542_v45 }
 0x133   : > { %v475_v48 = vpop.f32.mrf.mxu1  ;;  %796 = vmatmul.msk.bf16.vlgmr.msra.gmra.mxu2 %vm436_vm3, %v558_v47 }
 0x134   : > { %v476_v49 = vadd.f32 %v1090_v39, %v475_v48  ;;  %v863_v48 = vld [vmem:[%s1179_s5] ss:$0 sm:$0xff] }
 0x136   : > { %v528_v51 = vmul.f32 0.01, %v476_v49  ;;  %vm512_vm5 = vcmp.ge.f32.partialorder %v476_v49, 0.0 }
 0x138   : > { %v544_v54 = vsel %vm512_vm5, %v476_v49, %v528_v51 }
 0x13b   : > { %v477_v50 = vpop.f32.mrf.mxu1 }
 0x13c   : > { %v478_v52 = vadd.f32 %v1090_v39, %v477_v50 }
 0x13e   : > { %vm513_vm6 = vcmp.ge.f32.partialorder %v478_v52, 0.0  ;;  %v529_v53 = vmul.f32 0.01, %v478_v52 }
 0x140   : > { %v545_v55 = vsel %vm513_vm6, %v478_v52, %v529_v53 }
 0x141   : > { %v559_v56 = vpack.c.bf16 %v545_v55, %v544_v54 }
 0x143   : > { %v480_v57 = vpop.f32.mrf.mxu1  ;;  %797 = vmatmul.msk.bf16.gmra.mxu2 %vm436_vm3, %v559_v56 }
 0x144   : > { %v481_v58 = vadd.f32 %v1090_v39, %v480_v57 }
 0x146   : > { %v530_v60 = vmul.f32 0.01, %v481_v58  ;;  %vm514_vm7 = vcmp.ge.f32.partialorder %v481_v58, 0.0 }
 0x148   : > { %v546_v63 = vsel %vm514_vm7, %v481_v58, %v530_v60 }
 0x14b   : > { %v482_v59 = vpop.f32.mrf.mxu1 }
 0x14c   : > { %v483_v61 = vadd.f32 %v1090_v39, %v482_v59 }
 0x14e   : > { %vm515_vm8 = vcmp.ge.f32.partialorder %v483_v61, 0.0  ;;  %v531_v62 = vmul.f32 0.01, %v483_v61 }
 0x150   : > { %v547_v0 = vsel %vm515_vm8, %v483_v61, %v531_v62 }
 0x151   : > { %v560_v1 = vpack.c.bf16 %v547_v0, %v546_v63 }
 0x153   : > { %v485_v2 = vpop.f32.mrf.mxu1  ;;  %798 = vmatmul.msk.bf16.gmra.mxu2 %vm436_vm3, %v560_v1 }
 0x154   : > { %v486_v3 = vadd.f32 %v1090_v39, %v485_v2 }
 0x156   : > { %v532_v5 = vmul.f32 0.01, %v486_v3  ;;  %vm516_vm9 = vcmp.ge.f32.partialorder %v486_v3, 0.0 }
 0x158   : > { %v548_v8 = vsel %vm516_vm9, %v486_v3, %v532_v5 }
 0x15b   : > { %v487_v4 = vpop.f32.mrf.mxu1 }
 0x15c   : > { %v488_v6 = vadd.f32 %v1090_v39, %v487_v4 }
 0x15e   : > { %vm517_vm10 = vcmp.ge.f32.partialorder %v488_v6, 0.0  ;;  %v533_v7 = vmul.f32 0.01, %v488_v6 }
 0x160   : > { %v549_v9 = vsel %vm517_vm10, %v488_v6, %v533_v7 }
 0x161   : > { %v561_v10 = vpack.c.bf16 %v549_v9, %v548_v8 }
 0x163   : > { %v490_v11 = vpop.f32.mrf.mxu1  ;;  %799 = vmatmul.msk.bf16.gmra.mxu2 %vm436_vm3, %v561_v10 }
 0x164   : > { %v491_v12 = vadd.f32 %v1090_v39, %v490_v11 }
 0x166   : > { %v534_v14 = vmul.f32 0.01, %v491_v12  ;;  %vm518_vm11 = vcmp.ge.f32.partialorder %v491_v12, 0.0 }
 0x168   : > { %v550_v17 = vsel %vm518_vm11, %v491_v12, %v534_v14 }
 0x16b   : > { %v492_v13 = vpop.f32.mrf.mxu1 }
 0x16c   : > { %v493_v15 = vadd.f32 %v1090_v39, %v492_v13 }
 0x16e   : > { %vm519_vm12 = vcmp.ge.f32.partialorder %v493_v15, 0.0  ;;  %v535_v16 = vmul.f32 0.01, %v493_v15 }
 0x170   : > { %v551_v18 = vsel %vm519_vm12, %v493_v15, %v535_v16 }
 0x171   : > { %v562_v19 = vpack.c.bf16 %v551_v18, %v550_v17 }
 0x173   : > { %v495_v20 = vpop.f32.mrf.mxu1  ;;  %800 = vmatmul.msk.bf16.gmra.mxu2 %vm436_vm3, %v562_v19 }
 0x174   : > { %v496_v21 = vadd.f32 %v1090_v39, %v495_v20 }
 0x176   : > { %v536_v23 = vmul.f32 0.01, %v496_v21  ;;  %vm520_vm13 = vcmp.ge.f32.partialorder %v496_v21, 0.0 }
 0x178   : > { %v552_v26 = vsel %vm520_vm13, %v496_v21, %v536_v23 }
 0x17b   : > { %v497_v22 = vpop.f32.mrf.mxu1 }
 0x17c   : > { %v498_v24 = vadd.f32 %v1090_v39, %v497_v22 }
 0x17e   : > { %vm521_vm14 = vcmp.ge.f32.partialorder %v498_v24, 0.0  ;;  %v537_v25 = vmul.f32 0.01, %v498_v24 }
 0x180   : > { %v553_v27 = vsel %vm521_vm14, %v498_v24, %v537_v25 }
 0x181   : > { %v563_v29 = vpack.c.bf16 %v553_v27, %v552_v26 }
 0x183   : > { %801 = vmatmul.msk.bf16.gmra.mxu2 %vm436_vm3, %v563_v29 }
 0x189   : > { %v500_v30 = vpop.f32.mrf.mxu3 }
 0x18a   : > { %v501_v31 = vadd.f32 %v1090_v39, %v500_v30 }
 0x18c   : > { %v538_v33 = vmul.f32 0.01, %v501_v31  ;;  %vm522_vm15 = vcmp.ge.f32.partialorder %v501_v31, 0.0 }
 0x18e   : > { %v554_v36 = vsel %vm522_vm15, %v501_v31, %v538_v33 }
 0x191   : > { %v502_v32 = vpop.f32.mrf.mxu3 }
 0x192   : > { %v503_v34 = vadd.f32 %v1090_v39, %v502_v32 }
 0x194   : > { %vm523_vm0 = vcmp.ge.f32.partialorder %v503_v34, 0.0  ;;  %v539_v35 = vmul.f32 0.01, %v503_v34 }
 0x196   : > { %v555_v37 = vsel %vm523_vm0, %v503_v34, %v539_v35 }
 0x197   : > { %v564_v38 = vpack.c.bf16 %v555_v37, %v554_v36 }
 0x199   : > { %v505_v28 = vpop.f32.mrf.mxu3  ;;  %802 = vmatmul.msk.bf16.vlgmr.msra.gmra.mxu3 %vm436_vm3, %v564_v38 }
 0x19a   : > { %v506_v40 = vadd.f32 %v1090_v39, %v505_v28 }
 0x19c   : > { %v540_v42 = vmul.f32 0.01, %v506_v40  ;;  %vm524_vm1 = vcmp.ge.f32.partialorder %v506_v40, 0.0 }
 0x19e   : > { %v556_v45 = vsel %vm524_vm1, %v506_v40, %v540_v42 }
 0x1a1   : > { %v507_v41 = vpop.f32.mrf.mxu3 }
 0x1a2   : > { %v508_v43 = vadd.f32 %v1090_v39, %v507_v41 }
 0x1a4   : > { %vm525_vm2 = vcmp.ge.f32.partialorder %v508_v43, 0.0  ;;  %v541_v44 = vmul.f32 0.01, %v508_v43 }
 0x1a6   : > { %v557_v46 = vsel %vm525_vm2, %v508_v43, %v541_v44 }
 0x1a7   : > { %v565_v47 = vpack.c.bf16 %v557_v46, %v556_v45 }
 0x1a9   : > { %803 = vmatmul.msk.bf16.gmra.mxu3 %vm436_vm3, %v565_v47 }
 0x1b6   : > { %v619_v49 = vpop.f32.mrf.mxu2 }
 0x1b7   : > { %v620_v50 = vadd.f32 %v863_v48, %v619_v49 }
 0x1b9   : > { %659 = vst [vmem:[%s1122_s17] sm:$0xff] %v620_v50 }
 0x1be   : > { %v621_v39 = vpop.f32.mrf.mxu2 }
 0x1bf   : > { %v622_v51 = vadd.f32 %v863_v48, %v621_v39 }
 0x1c1   : > { %660 = vst [vmem:[%s1122_s17 + $0x8] sm:$0xff] %v622_v51 }
 0x1c6   : > { %v624_v52 = vpop.f32.mrf.mxu2 }
 0x1c7   : > { %v625_v53 = vadd.f32 %v863_v48, %v624_v52 }
 0x1c9   : > { %661 = vst [vmem:[%s1122_s17 + $0x10] sm:$0xff] %v625_v53 }
 0x1ce   : > { %v626_v54 = vpop.f32.mrf.mxu2 }
 0x1cf   : > { %v627_v55 = vadd.f32 %v863_v48, %v626_v54 }
 0x1d1   : > { %662 = vst [vmem:[%s1122_s17 + $0x18] sm:$0xff] %v627_v55 }
 0x1d6   : > { %v629_v56 = vpop.f32.mrf.mxu2 }
 0x1d7   : > { %v630_v57 = vadd.f32 %v863_v48, %v629_v56 }
 0x1d9   : > { %663 = vst [vmem:[%s1122_s17 + $0x20] sm:$0xff] %v630_v57 }
 0x1de   : > { %v631_v58 = vpop.f32.mrf.mxu2 }
 0x1df   : > { %v632_v59 = vadd.f32 %v863_v48, %v631_v58 }
 0x1e1   : > { %664 = vst [vmem:[%s1122_s17 + $0x28] sm:$0xff] %v632_v59 }
 0x1e6   : > { %v634_v60 = vpop.f32.mrf.mxu2 }
 0x1e7   : > { %v635_v61 = vadd.f32 %v863_v48, %v634_v60 }
 0x1e9   : > { %665 = vst [vmem:[%s1122_s17 + $0x30] sm:$0xff] %v635_v61 }
 0x1ee   : > { %v636_v62 = vpop.f32.mrf.mxu2 }
 0x1ef   : > { %v637_v63 = vadd.f32 %v863_v48, %v636_v62 }
 0x1f1   : > { %666 = vst [vmem:[%s1122_s17 + $0x38] sm:$0xff] %v637_v63 }
 0x1f6   : > { %v639_v0 = vpop.f32.mrf.mxu2 }
 0x1f7   : > { %v640_v1 = vadd.f32 %v863_v48, %v639_v0 }
 0x1f9   : > { %667 = vst [vmem:[%s1122_s17 + $0x40] sm:$0xff] %v640_v1 }
 0x1fe   : > { %v641_v2 = vpop.f32.mrf.mxu2 }
 0x1ff   : > { %v642_v3 = vadd.f32 %v863_v48, %v641_v2 }
 0x201   : > { %668 = vst [vmem:[%s1122_s17 + $0x48] sm:$0xff] %v642_v3 }
 0x206   : > { %v644_v4 = vpop.f32.mrf.mxu2 }
 0x207   : > { %v645_v5 = vadd.f32 %v863_v48, %v644_v4 }
 0x209   : > { %669 = vst [vmem:[%s1122_s17 + $0x50] sm:$0xff] %v645_v5 }
 0x20e   : > { %v646_v6 = vpop.f32.mrf.mxu2 }
 0x20f   : > { %v647_v7 = vadd.f32 %v863_v48, %v646_v6 }
 0x211   : > { %670 = vst [vmem:[%s1122_s17 + $0x58] sm:$0xff] %v647_v7 }
 0x21c   : > { %v649_v8 = vpop.f32.mrf.mxu3 }
 0x21d   : > { %v650_v9 = vadd.f32 %v863_v48, %v649_v8 }
 0x21f   : > { %671 = vst [vmem:[%s1122_s17 + $0x60] sm:$0xff] %v650_v9 }
 0x224   : > { %v651_v10 = vpop.f32.mrf.mxu3 }
 0x225   : > { %v652_v11 = vadd.f32 %v863_v48, %v651_v10 }
 0x227   : > { %672 = vst [vmem:[%s1122_s17 + $0x68] sm:$0xff] %v652_v11 }
 0x22c   : > { %v654_v12 = vpop.f32.mrf.mxu3 }
 0x22d   : > { %v655_v13 = vadd.f32 %v863_v48, %v654_v12 }
 0x22f   : > { %673 = vst [vmem:[%s1122_s17 + $0x70] sm:$0xff] %v655_v13 }
 0x234   : > { %v656_v14 = vpop.f32.mrf.mxu3 }
 0x235   : > { %v657_v15 = vadd.f32 %v863_v48, %v656_v14 }
 0x237   : > { %674 = vst [vmem:[%s1122_s17 + $0x78] sm:$0xff] %v657_v15 }
 0x238   : > { %891 = shalt.err (!%p888_p3)
}
 0x239   : > { %s928_s13 = smov 128   ;;  %s929_s17 = smov 8  }
 0x23a   : > { %820 = dma.vmem_to_hbm [thread:$0]  (%p1003_p5), %s689_s28, 2048, %s691_s29, %s676_s9, %s928_s13, %s928_s13, %s929_s17  }
 0x23b PF: > { %p826_p4 = scmp.ge.s32.totalorder %s926_s24, 2  ;;  %s705_s18 = sand.u32 1, %s914_s21  }
 0x23c   : > { %s706_s19 = scalar_lea.sflag [#allocation3], %s705_s18 }
 0x23d   : > { %p823_p7 = pnand %p826_p4, %p1007_p6 }
 0x23f   : > { %p824_p8 = pneg %p823_p7 }
 0x241   : > { %909 = dma.done.wait (%p824_p8), %s706_s19, 2048  }
 0x242   : > { %911 = vsyncadd (%p824_p8), %s706_s19, 4294965248  ;;  %p16_p9 = scmp.ge.s32.totalorder %s990_s27, 4   ;;  %s1183_s21 = smov %s918_s22 }
 0x243   : > { %s1184_s22 = smov %s922_s23  ;;  %s1185_s23 = smov %s1001_s30 }
 0x244   : > { %s1186_s24 = smov %s990_s27  ;;  %18 = sbr.rel (!%p16_p9) target bundleno = 3 (0x3), region = 79 }
 0x249   :  { %712 = vsyncpa [#allocation3], 1 }
 0x24a   :  { %714 = vsyncpa [#allocation3 + $0x1], 1 }

</bundles_post_ra>
